<compile_context>
chip_gen: v7x
topology: tpu7x:2x2x1
jax: 0.10.0
libtpu: 0.0.40
codegen_flags: <defaults>
</compile_context>

<pallas_src>
import functools

import jax
import jax.numpy as jnp
from jax.experimental import pallas as pl
from jax.experimental.pallas import tpu as pltpu

LANE = 128          # output columns padded to a multiple of this (lane-dense stores)
MAX_TILE_B = 256    # MXU-filling M tile on v6e/v7x (128 already fills v5e's 4x128^2 MXU)


# --------------------------------------------------------------------------- #
# Pallas kernel
# --------------------------------------------------------------------------- #
def fc_classifier_kernel(x_ref, w1_ref, shift_ref, w2_ref, b2_ref, out_ref):
    """Fused Linear -> folded-BN(+bias) -> ReLU -> Linear for one batch tile.

    x_ref     : (TILE_B, F)      f32 activations (cast to bf16 in-kernel)
    w1_ref    : (F, H)           bf16 first linear weight, BN scale pre-folded in
    shift_ref : (1, H)           f32 folded (bias1 + BN) shift
    w2_ref    : (H, O_pad)       bf16 second linear weight (zero-padded cols)
    b2_ref    : (1, O_pad)       f32 second linear bias (zero-padded)
    out_ref   : (TILE_B, O_pad)  f32 logits
    """
    x = x_ref[...].astype(w1_ref.dtype)             # single in-kernel bf16 cast
    h = jnp.dot(x, w1_ref[...], preferred_element_type=jnp.float32)
    h = jnp.maximum(h + shift_ref[...], 0.0)        # BN scale already folded into w1
    # Dropout: identity in inference mode.
    out_ref[...] = (
        jnp.dot(h.astype(w2_ref.dtype), w2_ref[...],
                preferred_element_type=jnp.float32)
        + b2_ref[...]
    ).astype(out_ref.dtype)


# --------------------------------------------------------------------------- #
# One-time parameter preparation (hoisted out of the per-call path)
# --------------------------------------------------------------------------- #
def prepare_fc_classifier_params(params, eps=1e-5):
    """Fold Linear1 bias + BatchNorm into (scale, shift), fold scale into W1,
    pad the classifier width to a 128-lane multiple, and cast weights to bf16.
    Call ONCE; reuse the result for every forward call."""
    w1, b1 = params["w1"], params["b1"]
    gamma, beta = params["gamma"], params["beta"]
    mean, var = params["mean"], params["var"]
    w2, b2 = params["w2"], params["b2"]

    H = w1.shape[1]
    O = w2.shape[1]
    O_pad = max(LANE, ((O + LANE - 1) // LANE) * LANE)

    scale = gamma * jax.lax.rsqrt(var + eps)
    shift = beta + scale * (b1 - mean)

    w1_folded = (w1 * scale[None, :]).astype(jnp.bfloat16)     # BN scale -> W1 columns
    w2_pad = jnp.zeros((H, O_pad), jnp.float32).at[:, :O].set(w2).astype(jnp.bfloat16)
    b2_pad = jnp.zeros((1, O_pad), jnp.float32).at[0, :O].set(b2)

    return {
        "w1": w1_folded,                                   # (F, H)      bf16
        "shift": shift.reshape(1, H).astype(jnp.float32),  # (1, H)      f32
        "w2": w2_pad,                                      # (H, O_pad)  bf16
        "b2": b2_pad,                                      # (1, O_pad)  f32
    }


# --------------------------------------------------------------------------- #
# Per-call forward
# --------------------------------------------------------------------------- #
@functools.partial(jax.jit, static_argnames=("n_classes",))
def fc_classifier_forward(x, prep, *, n_classes):
    """x: (B, F) float32, prep: output of prepare_fc_classifier_params.
    Returns logits (B, n_classes) float32."""
    B, F = x.shape
    H = prep["w1"].shape[1]
    O_pad = prep["w2"].shape[1]

    # Batch tile: smallest multiple of 8 covering B (single grid step for tiny
    # batches), capped at an MXU-filling 256 rows for large batches.
    tile_b = min(MAX_TILE_B, ((B + 7) // 8) * 8)
    n_tiles = pl.cdiv(B, tile_b)

    # Only shard the batch axis across TensorCores (v7x megacore) when there is
    # more than one tile; otherwise a split just duplicates the weight DMA.
    semantics = ("parallel",) if n_tiles > 1 else ("arbitrary",)

    flops = 2 * B * (F * H + H * O_pad)
    bytes_accessed = (
        x.size * x.dtype.itemsize
        + prep["w1"].size * 2
        + prep["w2"].size * 2
        + (prep["shift"].size + prep["b2"].size) * 4
        + B * O_pad * 4
    )

    out_pad = pl.pallas_call(
        fc_classifier_kernel,
        out_shape=jax.ShapeDtypeStruct((B, O_pad), jnp.float32),
        grid=(n_tiles,),
        in_specs=[
            pl.BlockSpec((tile_b, F), lambda i: (i, 0)),
            # Constant-index parameter blocks (fetched once, reused each step).
            pl.BlockSpec((F, H), lambda i: (0, 0)),
            pl.BlockSpec((1, H), lambda i: (0, 0)),
            pl.BlockSpec((H, O_pad), lambda i: (0, 0)),
            pl.BlockSpec((1, O_pad), lambda i: (0, 0)),
        ],
        out_specs=pl.BlockSpec((tile_b, O_pad), lambda i: (i, 0)),
        compiler_params=pltpu.CompilerParams(
            dimension_semantics=semantics,
            vmem_limit_bytes=32 * 1024 * 1024,
        ),
        cost_estimate=pl.CostEstimate(
            flops=flops, transcendentals=0, bytes_accessed=bytes_accessed
        ),
    )(x, prep["w1"], prep["shift"], prep["w2"], prep["b2"])

    return out_pad[:, :n_classes]


# --------------------------------------------------------------------------- #
# Pure-JAX reference (mirrors the PyTorch module in eval mode)
# --------------------------------------------------------------------------- #
def fc_classifier_ref(x, params, eps=1e-5):
    h = x @ params["w1"] + params["b1"]
    h = (h - params["mean"]) / jnp.sqrt(params["var"] + eps)
    h = h * params["gamma"] + params["beta"]
    h = jnp.maximum(h, 0.0)
    # Dropout is identity in eval mode.
    return h @ params["w2"] + params["b2"]


# --------------------------------------------------------------------------- #
# Parameter construction (deterministic, synthetic)
# --------------------------------------------------------------------------- #
def init_fc_classifier_params(key, in_features, hidden_dims, n_classes):
    k = jax.random.split(key, 8)
    return {
        "w1": jax.random.normal(k[0], (in_features, hidden_dims), jnp.float32) * 0.05,
        "b1": jax.random.normal(k[1], (hidden_dims,), jnp.float32) * 0.1,
        "gamma": 1.0 + 0.1 * jax.random.normal(k[2], (hidden_dims,), jnp.float32),
        "beta": 0.1 * jax.random.normal(k[3], (hidden_dims,), jnp.float32),
        "mean": 0.1 * jax.random.normal(k[4], (hidden_dims,), jnp.float32),
        "var": 0.5 + jax.random.uniform(k[5], (hidden_dims,), jnp.float32),
        "w2": jax.random.normal(k[6], (hidden_dims, n_classes), jnp.float32) * 0.05,
        "b2": jax.random.normal(k[7], (n_classes,), jnp.float32) * 0.1,
    }


# --------------------------------------------------------------------------- #
if __name__ == "__main__":
    B = 2
    IN_FEATURES = 512      # LazyLinear input width (e.g. flattened embedding)
    HIDDEN_DIMS = 256
    N_CLASSES = 8

    key = jax.random.PRNGKey(0)
    kx, kx2, kp = jax.random.split(key, 3)
    x = jax.random.normal(kx, (B, IN_FEATURES), jnp.float32)
    params = init_fc_classifier_params(kp, IN_FEATURES, HIDDEN_DIMS, N_CLASSES)

    # One-time parameter prep, outside the per-call path.
    prep = prepare_fc_classifier_params(params)
    prep = jax.block_until_ready(prep)

    logits = fc_classifier_forward(x, prep, n_classes=N_CLASSES)
    jax.block_until_ready(logits)
    assert logits.shape == (B, N_CLASSES)

    ref = fc_classifier_ref(x, params)
    max_err = float(jnp.max(jnp.abs(logits - ref)))
    assert max_err < 0.1, f"max abs error vs f32 reference too large: {max_err}"

    # Also exercise a batch that does not divide the tile (partial-block masking).
    x2 = jax.random.normal(kx2, (33, IN_FEATURES), jnp.float32)
    logits2 = fc_classifier_forward(x2, prep, n_classes=N_CLASSES)
    jax.block_until_ready(logits2)
    ref2 = fc_classifier_ref(x2, params)
    max_err2 = float(jnp.max(jnp.abs(logits2 - ref2)))
    assert max_err2 < 0.1, f"partial-block case error too large: {max_err2}"

    print("KERNEL_OK")
</pallas_src>

<mosaic_0001>
module attributes {stable_mosaic.version = 11 : i64} {
  func.func @fc_classifier_kernel(%arg0: i32, %arg1: memref<8x512xf32, #tpu.memory_space<vmem>>, %arg2: memref<512x256xbf16, #tpu.memory_space<vmem>>, %arg3: memref<1x256xf32, #tpu.memory_space<vmem>>, %arg4: memref<256x128xbf16, #tpu.memory_space<vmem>>, %arg5: memref<1x128xf32, #tpu.memory_space<vmem>>, %arg6: memref<8x128xf32, #tpu.memory_space<vmem>>) attributes {dimension_semantics = [#tpu.dimension_semantics<arbitrary>], iteration_bounds = array<i64: 1>, scalar_prefetch = 0 : i64, scratch_operands = 0 : i64, tpu.core_type = #tpu.core_type<tc>, window_params = [{transform_indices = @transform_0, window_bounds = array<i64: 8, 512>}, {pipeline_mode = #tpu.pipeline_mode<synchronous>, transform_indices = @transform_1, window_bounds = array<i64: 512, 256>}, {pipeline_mode = #tpu.pipeline_mode<synchronous>, transform_indices = @transform_2, window_bounds = array<i64: 1, 256>}, {pipeline_mode = #tpu.pipeline_mode<synchronous>, transform_indices = @transform_3, window_bounds = array<i64: 256, 128>}, {pipeline_mode = #tpu.pipeline_mode<synchronous>, transform_indices = @transform_4, window_bounds = array<i64: 1, 128>}, {transform_indices = @transform_5, window_bounds = array<i64: 8, 128>}]} {
    %c0 = arith.constant 0 : index
    %c0_0 = arith.constant 0 : index
    %0 = vector.load %arg1[%c0, %c0_0] : memref<8x512xf32, #tpu.memory_space<vmem>>, vector<8x512xf32>
    %1 = arith.truncf %0 : vector<8x512xf32> to vector<8x512xbf16>
    %c0_1 = arith.constant 0 : index
    %c0_2 = arith.constant 0 : index
    %2 = vector.load %arg2[%c0_1, %c0_2] : memref<512x256xbf16, #tpu.memory_space<vmem>>, vector<512x256xbf16>
    %cst = arith.constant dense<0.000000e+00> : vector<8x256xf32>
    %3 = tpu.matmul %1, %2, %cst {dimension_numbers = #tpu.dot_dimension_numbers<[1], [0], [0], [1], [0, 0, 1, 1], [], []>} : vector<8x512xbf16>, vector<512x256xbf16>, vector<8x256xf32> -> vector<8x256xf32>
    %c0_3 = arith.constant 0 : index
    %c0_4 = arith.constant 0 : index
    %4 = vector.load %arg3[%c0_3, %c0_4] : memref<1x256xf32, #tpu.memory_space<vmem>>, vector<1x256xf32>
    %5 = vector.broadcast %4 : vector<1x256xf32> to vector<8x256xf32>
    %6 = arith.addf %3, %5 : vector<8x256xf32>
    %cst_5 = arith.constant 0.000000e+00 : f32
    %7 = vector.broadcast %cst_5 : f32 to vector<8x256xf32>
    %8 = arith.maximumf %6, %7 : vector<8x256xf32>
    %9 = arith.truncf %8 : vector<8x256xf32> to vector<8x256xbf16>
    %c0_6 = arith.constant 0 : index
    %c0_7 = arith.constant 0 : index
    %10 = vector.load %arg4[%c0_6, %c0_7] : memref<256x128xbf16, #tpu.memory_space<vmem>>, vector<256x128xbf16>
    %cst_8 = arith.constant dense<0.000000e+00> : vector<8x128xf32>
    %11 = tpu.matmul %9, %10, %cst_8 {dimension_numbers = #tpu.dot_dimension_numbers<[1], [0], [0], [1], [0, 0, 1, 1], [], []>} : vector<8x256xbf16>, vector<256x128xbf16>, vector<8x128xf32> -> vector<8x128xf32>
    %c0_9 = arith.constant 0 : index
    %c0_10 = arith.constant 0 : index
    %12 = vector.load %arg5[%c0_9, %c0_10] : memref<1x128xf32, #tpu.memory_space<vmem>>, vector<1x128xf32>
    %13 = vector.broadcast %12 : vector<1x128xf32> to vector<8x128xf32>
    %14 = arith.addf %11, %13 : vector<8x128xf32>
    %c0_11 = arith.constant 0 : index
    %c0_12 = arith.constant 0 : index
    %15 = vector.load %arg6[%c0_11, %c0_12] : memref<8x128xf32, #tpu.memory_space<vmem>>, vector<8x128xf32>
    tpu.vector_store %arg6[%c0_11, %c0_12], %14 {strides = array<i32>} : memref<8x128xf32, #tpu.memory_space<vmem>>, vector<8x128xf32>,
    return
  }
  func.func @transform_0(%arg0: i32) -> (i32, i32) {
    %c0_i32 = arith.constant 0 : i32
    %c0_i32_0 = arith.constant 0 : i32
    return %arg0, %c0_i32 : i32, i32
  }
  func.func @transform_1(%arg0: i32) -> (i32, i32) {
    %c0_i32 = arith.constant 0 : i32
    %c0_i32_0 = arith.constant 0 : i32
    %c0_i32_1 = arith.constant 0 : i32
    return %c0_i32, %c0_i32_0 : i32, i32
  }
  func.func @transform_2(%arg0: i32) -> (i32, i32) {
    %c0_i32 = arith.constant 0 : i32
    %c0_i32_0 = arith.constant 0 : i32
    %c0_i32_1 = arith.constant 0 : i32
    return %c0_i32, %c0_i32_0 : i32, i32
  }
  func.func @transform_3(%arg0: i32) -> (i32, i32) {
    %c0_i32 = arith.constant 0 : i32
    %c0_i32_0 = arith.constant 0 : i32
    %c0_i32_1 = arith.constant 0 : i32
    return %c0_i32, %c0_i32_0 : i32, i32
  }
  func.func @transform_4(%arg0: i32) -> (i32, i32) {
    %c0_i32 = arith.constant 0 : i32
    %c0_i32_0 = arith.constant 0 : i32
    %c0_i32_1 = arith.constant 0 : i32
    return %c0_i32, %c0_i32_0 : i32, i32
  }
  func.func @transform_5(%arg0: i32) -> (i32, i32) {
    %c0_i32 = arith.constant 0 : i32
    %c0_i32_0 = arith.constant 0 : i32
    return %arg0, %c0_i32 : i32, i32
  }
}

</mosaic_0001>

<bundles_post_ra>
// kernel: fc_classifier_forward.1
= control target key start
LH: loop header
LB: loop body
LE: loop exit
PB: predicated region body
PF: predicated region fallthrough
CT: control target
= control target key end

     0   :  { %10 = vsyncpa [#allocation3], 0  ;;  %s1229_s0 = inlined_call_operand.hbm [shape: f32[2,512], index: 0, kind: input, shape index: {}]   ;;  %s1230_s1 = inlined_call_operand.hbm [shape: bf16[512,256], index: 1, kind: input, shape index: {}]   ;;  %s1231_s2 = inlined_call_operand.vmem [shape: f32[1,256], index: 2, kind: input, shape index: {}]   ;;  %s1232_s3 = inlined_call_operand.hbm [shape: bf16[256,128], index: 3, kind: input, shape index: {}]   ;;  %s1233_s4 = inlined_call_operand.vmem [shape: f32[1,128], index: 4, kind: input, shape index: {}]   ;;  %s1234_s5 = inlined_call_operand.hbm [shape: f32[2,128], index: 5, kind: output, shape index: {}]  }
   0x1   :  { %11 = vsyncpa [#allocation6], 0 }
   0x2   :  { %12 = vsyncpa [#allocation4], 0 }
   0x3   :  { %17 = vsyncadd [#allocation3], 384  ;;  %s1121_s18 = smov [#allocation5]   ;;  %s1122_s20 = smov [#allocation2]  }
   0x4   :  { %s30_s19 = sshll.u32 %s1121_s18, 4  ;;  %s18_s21 = sshll.u32 %s1122_s20, 4  ;;  %s31_s19 = int_to_ptr.vmem [resolvable:$true] %s30_s19  ;;  %s1162_s21 = int_to_ptr.vmem [resolvable:$true] %s18_s21 }
   0x5   :  { %s1027_s24 = scalar_lea.hbm %s1230_s1, 8192 }
   0x6   :  { %p1028_p0 = scmp.ne.s32.totalorder %s1230_s1, %s1027_s24  ;;  %p1031_p1 = scmp.lt.u32.totalorder %s1027_s24, %s1230_s1 }
   0x8   :  { %p1033_p2 = pnand %p1031_p1, %p1028_p0 }
   0xa   :  { %1036 = shalt.err (!%p1033_p2)
}
   0xb   :  { %s1037_s29 = scalar_lea.vmem %s31_s19, 8192  ;;  %p1042_p4 = scmp.lt.s32.totalorder %s31_s19, %s31_s19 }
   0xc   :  { %p1038_p3 = scmp.ne.s32.totalorder %s31_s19, %s1037_s29  ;;  %p1043_p5 = scmp.lt.s32.totalorder %s1037_s29, %s1037_s29 }
   0xe   :  { %p1044_p6 = por %p1043_p5, %p1042_p4 }
  0x10   :  { %p1045_p7 = pnand %p1044_p6, %p1038_p3 }
  0x12   :  { %1048 = shalt.err (!%p1045_p7)
}
  0x13   :  { %s1123_s30 = smov 128   ;;  %s1124_s6 = smov 8  }
  0x14   :  { %36 = dma.hbm_to_vmem [thread:$0]  %s1230_s1, 8192, %s31_s19, [#allocation6], %s1123_s30, %s1123_s30, %s1124_s6  }
  0x15   :  { %s1049_s11 = scalar_lea.hbm %s1229_s0, 128 }
  0x16   :  { %p1050_p8 = scmp.ne.s32.totalorder %s1229_s0, %s1049_s11  ;;  %p1053_p9 = scmp.lt.u32.totalorder %s1049_s11, %s1229_s0 }
  0x18   :  { %p1055_p10 = pnand %p1053_p9, %p1050_p8 }
  0x1a   :  { %1058 = shalt.err (!%p1055_p10)
}
  0x1b   :  { %s1059_s16 = scalar_lea.vmem %s1162_s21, 128  ;;  %s1063_s1 = scalar_lea.vmem %s1162_s21, 512 }
  0x1c   :  { %p1060_p11 = scmp.ne.s32.totalorder %s1162_s21, %s1059_s16  ;;  %p1064_p12 = scmp.lt.s32.totalorder %s1162_s21, %s1162_s21 }
  0x1d   :  { %p1065_p13 = scmp.lt.s32.totalorder %s1063_s1, %s1059_s16 }
  0x1f   :  { %p1066_p0 = por %p1065_p13, %p1064_p12 }
  0x21   :  { %p1067_p1 = pnand %p1066_p0, %p1060_p11 }
  0x23   :  { %1070 = shalt.err (!%p1067_p1)
}
  0x24   :  { %24 = dma.hbm_to_vmem [thread:$0]  %s1229_s0, 128, %s1162_s21, [#allocation3], %s1123_s30, %s1123_s30, %s1124_s6  }
  0x25   :  { %s1125_s19 = smov [#allocation7]   ;;  %s1071_s24 = scalar_lea.hbm %s1232_s3, 2048 }
  0x26   :  { %s44_s20 = sshll.u32 %s1125_s19, 4  ;;  %p1072_p2 = scmp.ne.s32.totalorder %s1232_s3, %s1071_s24  ;;  %s45_s20 = int_to_ptr.vmem [resolvable:$true] %s44_s20 }
  0x27   :  { %p1075_p3 = scmp.lt.u32.totalorder %s1071_s24, %s1232_s3 }
  0x29   :  { %p1077_p4 = pnand %p1075_p3, %p1072_p2 }
  0x2b   :  { %1080 = shalt.err (!%p1077_p4)
}
  0x2c   :  { %s1081_s29 = scalar_lea.vmem %s45_s20, 2048  ;;  %p1086_p6 = scmp.lt.s32.totalorder %s45_s20, %s45_s20 }
  0x2d   :  { %p1082_p5 = scmp.ne.s32.totalorder %s45_s20, %s1081_s29  ;;  %p1087_p7 = scmp.lt.s32.totalorder %s1081_s29, %s1081_s29 }
  0x2f   :  { %p1088_p8 = por %p1087_p7, %p1086_p6 }
  0x31   :  { %p1089_p9 = pnand %p1088_p8, %p1082_p5 }
  0x33   :  { %1092 = shalt.err (!%p1089_p9)
}
  0x34   :  { %s1126_s0 = smov 64   ;;  %s1127_s21 = smov 4  }
  0x35   :  { %50 = dma.hbm_to_vmem [thread:$0]  %s1232_s3, 2048, %s45_s20, [#allocation6], %s1126_s0, %s1126_s0, %s1127_s21  }
  0x36   :  { %1115 = dma.done.wait [#allocation3], 512  }
  0x37   :  { %1116 = vsyncadd [#allocation3], 4294966784 }
  0x38   :  { %1117 = dma.done.wait [#allocation6], 10240  }
  0x39   :  { %1118 = vsyncadd [#allocation6], 4294957056  ;;  %v909_v0 = vld [vmem:[#allocation5 + $0x4] ss:$8 sps:$4 sm:$0xff]   ;;  %v913_v2 = vld [vmem:[#allocation5] ss:$8 sps:$4 sm:$0xff]   ;;  %v78_v40 = vlaneseq }
  0x3a   :  { %v911_v1 = vld [vmem:[#allocation5 + $0x104] ss:$8 sps:$4 sm:$0xff]   ;;  %511 = vmatprep.subr.bf16.mxu1 %v909_v0  ;;  %v914_v3 = vld [vmem:[#allocation5 + $0x100] ss:$8 sps:$4 sm:$0xff]   ;;  %v915_v4 = vld [vmem:[#allocation5 + $0x14] ss:$8 sps:$4 sm:$0xff]  }
  0x3b   :  { %552 = vmatprep.subr.bf16.mxu0 %v911_v1  ;;  %512 = vmatpush1.bf16.msra.mxu1 %v913_v2  ;;  %v917_v5 = vld [vmem:[#allocation5 + $0x114] ss:$8 sps:$4 sm:$0xff]   ;;  %v919_v6 = vld [vmem:[#allocation5 + $0x10] ss:$8 sps:$4 sm:$0xff]   ;;  %v921_v8 = vld [vmem:[#allocation5 + $0x24] ss:$8 sps:$4 sm:$0xff]  }
  0x3c   :  { %553 = vmatpush1.bf16.msra.mxu0 %v914_v3  ;;  %513 = vmatprep.subr.bf16.mxu1 %v915_v4  ;;  %v920_v7 = vld [vmem:[#allocation5 + $0x110] ss:$8 sps:$4 sm:$0xff]   ;;  %v923_v9 = vld [vmem:[#allocation5 + $0x124] ss:$8 sps:$4 sm:$0xff]   ;;  %v925_v10 = vld [vmem:[#allocation5 + $0x20] ss:$8 sps:$4 sm:$0xff]  }
  0x3d   :  { %554 = vmatprep.subr.bf16.mxu0 %v917_v5  ;;  %v926_v11 = vld [vmem:[#allocation5 + $0x120] ss:$8 sps:$4 sm:$0xff]   ;;  %v927_v12 = vld [vmem:[#allocation5 + $0x34] ss:$8 sps:$4 sm:$0xff]   ;;  %v931_v14 = vld [vmem:[#allocation5 + $0x30] ss:$8 sps:$4 sm:$0xff]  }
  0x3e   :  { %v929_v13 = vld [vmem:[#allocation5 + $0x134] ss:$8 sps:$4 sm:$0xff]   ;;  %v932_v15 = vld [vmem:[#allocation5 + $0x130] ss:$8 sps:$4 sm:$0xff]   ;;  %v933_v16 = vld [vmem:[#allocation5 + $0x44] ss:$8 sps:$4 sm:$0xff]  }
  0x3f   :  { %514 = vmatpush1.bf16.msra.mxu1 %v919_v6  ;;  %v935_v17 = vld [vmem:[#allocation5 + $0x144] ss:$8 sps:$4 sm:$0xff]   ;;  %v937_v18 = vld [vmem:[#allocation5 + $0x40] ss:$8 sps:$4 sm:$0xff]   ;;  %v939_v20 = vld [vmem:[#allocation5 + $0x54] ss:$8 sps:$4 sm:$0xff]  }
  0x40   :  { %555 = vmatpush1.bf16.msra.mxu0 %v920_v7  ;;  %515 = vmatprep.subr.bf16.mxu1 %v921_v8  ;;  %v938_v19 = vld [vmem:[#allocation5 + $0x140] ss:$8 sps:$4 sm:$0xff]   ;;  %v941_v21 = vld [vmem:[#allocation5 + $0x154] ss:$8 sps:$4 sm:$0xff]   ;;  %v943_v22 = vld [vmem:[#allocation5 + $0x50] ss:$8 sps:$4 sm:$0xff]  }
  0x41   :  { %556 = vmatprep.subr.bf16.mxu0 %v923_v9  ;;  %v944_v23 = vld [vmem:[#allocation5 + $0x150] ss:$8 sps:$4 sm:$0xff]   ;;  %v945_v24 = vld [vmem:[#allocation5 + $0x64] ss:$8 sps:$4 sm:$0xff]   ;;  %v949_v26 = vld [vmem:[#allocation5 + $0x60] ss:$8 sps:$4 sm:$0xff]  }
  0x42   :  { %v947_v25 = vld [vmem:[#allocation5 + $0x164] ss:$8 sps:$4 sm:$0xff]   ;;  %v950_v27 = vld [vmem:[#allocation5 + $0x160] ss:$8 sps:$4 sm:$0xff]   ;;  %v951_v28 = vld [vmem:[#allocation5 + $0x74] ss:$8 sps:$4 sm:$0xff]  }
  0x43   :  { %516 = vmatpush1.bf16.msra.mxu1 %v925_v10  ;;  %v953_v29 = vld [vmem:[#allocation5 + $0x174] ss:$8 sps:$4 sm:$0xff]   ;;  %v955_v30 = vld [vmem:[#allocation5 + $0x70] ss:$8 sps:$4 sm:$0xff]   ;;  %v957_v32 = vld [vmem:[#allocation5 + $0x84] ss:$8 sps:$4 sm:$0xff]  }
  0x44   :  { %557 = vmatpush1.bf16.msra.mxu0 %v926_v11  ;;  %517 = vmatprep.subr.bf16.mxu1 %v927_v12  ;;  %v956_v31 = vld [vmem:[#allocation5 + $0x170] ss:$8 sps:$4 sm:$0xff]   ;;  %v959_v33 = vld [vmem:[#allocation5 + $0x184] ss:$8 sps:$4 sm:$0xff]   ;;  %v961_v34 = vld [vmem:[#allocation5 + $0x80] ss:$8 sps:$4 sm:$0xff]  }
  0x45   :  { %558 = vmatprep.subr.bf16.mxu0 %v929_v13  ;;  %v962_v35 = vld [vmem:[#allocation5 + $0x180] ss:$8 sps:$4 sm:$0xff]   ;;  %v963_v36 = vld [vmem:[#allocation5 + $0x94] ss:$8 sps:$4 sm:$0xff]   ;;  %v1128_v38 = vmov 1983009808  }
  0x46   :  { %v965_v37 = vld [vmem:[#allocation5 + $0x194] ss:$8 sps:$4 sm:$0xff]   ;;  %v76_v39 = vunpack.c.l.s4 %v1128_v38  ;;  %v967_v41 = vld [vmem:[#allocation5 + $0x90] ss:$8 sps:$4 sm:$0xff]   ;;  %v969_v43 = vld [vmem:[#allocation5 + $0xa4] ss:$8 sps:$4 sm:$0xff]  }
  0x47   :  { %518 = vmatpush1.bf16.msra.mxu1 %v931_v14  ;;  %v968_v42 = vld [vmem:[#allocation5 + $0x190] ss:$8 sps:$4 sm:$0xff]   ;;  %v971_v44 = vld [vmem:[#allocation5 + $0x1a4] ss:$8 sps:$4 sm:$0xff]   ;;  %v1206_v46 = vshrl.u32 %v78_v40, 7 }
  0x48   :  { %559 = vmatpush1.bf16.msra.mxu0 %v932_v15  ;;  %519 = vmatprep.subr.bf16.mxu1 %v933_v16  ;;  %v77_v45 = vunpack.c.0.s8 %v76_v39  ;;  %v973_v47 = vld [vmem:[#allocation5 + $0xa0] ss:$8 sps:$4 sm:$0xff]   ;;  %v975_v49 = vld [vmem:[#allocation5 + $0xb4] ss:$8 sps:$4 sm:$0xff]   ;;  %v979_v51 = vld [vmem:[#allocation5 + $0xb0] ss:$8 sps:$4 sm:$0xff]  }
  0x49   :  { %560 = vmatprep.subr.bf16.mxu0 %v935_v17  ;;  %v974_v48 = vld [vmem:[#allocation5 + $0x1a0] ss:$8 sps:$4 sm:$0xff]   ;;  %v977_v50 = vld [vmem:[#allocation5 + $0x1b4] ss:$8 sps:$4 sm:$0xff]   ;;  %v980_v52 = vld [vmem:[#allocation5 + $0x1b0] ss:$8 sps:$4 sm:$0xff]  }
  0x4a   :  { %v80_v53 = vsub.s32 %v77_v45, %v1206_v46  ;;  %v981_v54 = vld [vmem:[#allocation5 + $0xc4] ss:$8 sps:$4 sm:$0xff]   ;;  %v1005_v56 = vld [vmem:[#allocation2] ss:$8 sps:$4 sm:$0xff]   ;;  %v1007_v57 = vld [vmem:[#allocation2 + $0x10] ss:$8 sps:$4 sm:$0xff]  }
  0x4b   :  { %520 = vmatpush1.bf16.msra.mxu1 %v937_v18  ;;  %v983_v55 = vld [vmem:[#allocation5 + $0x1c4] ss:$8 sps:$4 sm:$0xff]   ;;  %v1010_v59 = vld [vmem:[#allocation2 + $0x14] ss:$8 sps:$4 sm:$0xff]   ;;  %v985_v60 = vld [vmem:[#allocation5 + $0xc0] ss:$8 sps:$4 sm:$0xff]  }
  0x4c   :  { %561 = vmatpush1.bf16.msra.mxu0 %v938_v19  ;;  %521 = vmatprep.subr.bf16.mxu1 %v939_v20  ;;  %v1009_v58 = vld [vmem:[#allocation2 + $0x4] ss:$8 sps:$4 sm:$0xff]   ;;  %v81_v61 = vrot.slane %v1005_v56, %v80_v53  ;;  %v95_v62 = vrot.slane %v1007_v57, %v80_v53  ;;  %v986_v0 = vld [vmem:[#allocation5 + $0x1c0] ss:$8 sps:$4 sm:$0xff]   ;;  %v102_v1 = vrot.slane %v1010_v59, %v80_v53  ;;  %v987_v2 = vld [vmem:[#allocation5 + $0xd4] ss:$8 sps:$4 sm:$0xff]  }
  0x4d   :  { %562 = vmatprep.subr.bf16.mxu0 %v941_v21  ;;  %v88_v63 = vrot.slane %v1009_v58, %v80_v53  ;;  %v989_v4 = vld [vmem:[#allocation5 + $0x1d4] ss:$8 sps:$4 sm:$0xff]   ;;  %v991_v6 = vld [vmem:[#allocation5 + $0xd0] ss:$8 sps:$4 sm:$0xff]   ;;  %v993_v10 = vld [vmem:[#allocation5 + $0xe4] ss:$8 sps:$4 sm:$0xff]  }
  0x4e   :  { %v104_v3 = vcombine.high %v81_v61, %v95_v62  ;;  %v992_v8 = vld [vmem:[#allocation5 + $0x1d0] ss:$8 sps:$4 sm:$0xff]   ;;  %v995_v11 = vld [vmem:[#allocation5 + $0x1e4] ss:$8 sps:$4 sm:$0xff]   ;;  %v997_v12 = vld [vmem:[#allocation5 + $0xe0] ss:$8 sps:$4 sm:$0xff]   ;;  %v103_v16 = vcombine.low %v81_v61, %v95_v62 }
  0x4f   :  { %522 = vmatpush1.bf16.msra.mxu1 %v943_v22  ;;  %v106_v5 = vcombine.high %v88_v63, %v102_v1  ;;  %v998_v13 = vld [vmem:[#allocation5 + $0x1e0] ss:$8 sps:$4 sm:$0xff]   ;;  %v999_v14 = vld [vmem:[#allocation5 + $0xf4] ss:$8 sps:$4 sm:$0xff]   ;;  %v105_v17 = vcombine.low %v88_v63, %v102_v1  ;;  %v1003_v18 = vld [vmem:[#allocation5 + $0xf0] ss:$8 sps:$4 sm:$0xff]  }
  0x50   :  { %563 = vmatpush1.bf16.msra.mxu0 %v944_v23  ;;  %523 = vmatprep.subr.bf16.mxu1 %v945_v24  ;;  %v112_v7 = vpack.c.bf16 %v104_v3, %v104_v3  ;;  %v1001_v15 = vld [vmem:[#allocation5 + $0x1f4] ss:$8 sps:$4 sm:$0xff]   ;;  %v1004_v19 = vld [vmem:[#allocation5 + $0x1f0] ss:$8 sps:$4 sm:$0xff]   ;;  %v1011_v20 = vld [vmem:[#allocation7 + $0x40] sm:$0xff]   ;;  %v111_v21 = vpack.c.bf16 %v103_v16, %v103_v16  ;;  %v183_v38 = vsub.s32 0, %v1206_v46 }
  0x51   :  { %564 = vmatprep.subr.bf16.mxu0 %v947_v25  ;;  %v114_v9 = vpack.c.bf16 %v106_v5, %v106_v5  ;;  %v113_v22 = vpack.c.bf16 %v105_v17, %v105_v17  ;;  %v1012_v23 = vld [vmem:[#allocation7] sm:$0xff]   ;;  %v1013_v24 = vld [vmem:[#allocation7 + $0x48] sm:$0xff]   ;;  %v187_v40 = vsub.s32 1, %v1206_v46 }
  0x52   :  { %543 = vmatprep.mubr.bf16.mxu1 %v112_v7  ;;  %v1014_v25 = vld [vmem:[#allocation7 + $0x8] sm:$0xff]   ;;  %v179_v39 = vld [vmem:[%s1231_s2] sm:$0x3] }
  0x53   :  { %524 = vmatpush1.bf16.msra.mxu1 %v949_v26  ;;  %584 = vmatprep.mubr.bf16.mxu0 %v114_v9  ;;  %v1015_v26 = vld [vmem:[#allocation7 + $0x50] sm:$0xff]  }
  0x54   :  { %565 = vmatpush1.bf16.msra.mxu0 %v950_v27  ;;  %525 = vmatprep.subr.bf16.mxu1 %v951_v28  ;;  %v1016_v27 = vld [vmem:[#allocation7 + $0x10] sm:$0xff]   ;;  %v1017_v28 = vld [vmem:[#allocation7 + $0x58] sm:$0xff]  }
  0x55   :  { %566 = vmatprep.subr.bf16.mxu0 %v953_v29  ;;  %v1018_v29 = vld [vmem:[#allocation7 + $0x18] sm:$0xff]  }
  0x57   :  { %526 = vmatpush1.bf16.msra.mxu1 %v955_v30  ;;  %v1019_v30 = vld [vmem:[#allocation7 + $0x60] sm:$0xff]  }
  0x58   :  { %567 = vmatpush1.bf16.msra.mxu0 %v956_v31  ;;  %527 = vmatprep.subr.bf16.mxu1 %v957_v32  ;;  %v1020_v31 = vld [vmem:[#allocation7 + $0x20] sm:$0xff]   ;;  %v1021_v32 = vld [vmem:[#allocation7 + $0x68] sm:$0xff]  }
  0x59   :  { %568 = vmatprep.subr.bf16.mxu0 %v959_v33  ;;  %v1022_v33 = vld [vmem:[#allocation7 + $0x28] sm:$0xff]  }
  0x5b   :  { %528 = vmatpush1.bf16.msra.mxu1 %v961_v34  ;;  %v1023_v34 = vld [vmem:[#allocation7 + $0x70] sm:$0xff]  }
  0x5c   :  { %569 = vmatpush1.bf16.msra.mxu0 %v962_v35  ;;  %529 = vmatprep.subr.bf16.mxu1 %v963_v36  ;;  %v1024_v35 = vld [vmem:[#allocation7 + $0x30] sm:$0xff]   ;;  %v1025_v36 = vld [vmem:[#allocation7 + $0x78] sm:$0xff]  }
  0x5d   :  { %570 = vmatprep.subr.bf16.mxu0 %v965_v37  ;;  %v1026_v37 = vld [vmem:[#allocation7 + $0x38] sm:$0xff]  }
  0x5f   :  { %530 = vmatpush1.bf16.msra.mxu1 %v967_v41  ;;  %v184_v41 = vrot.slane %v179_v39, %v183_v38 }
  0x60   :  { %571 = vmatpush1.bf16.msra.mxu0 %v968_v42  ;;  %531 = vmatprep.subr.bf16.mxu1 %v969_v43  ;;  %v188_v42 = vrot.slane %v179_v39, %v187_v40 }
  0x61   :  { %572 = vmatprep.subr.bf16.mxu0 %v971_v44 }
  0x63   :  { %532 = vmatpush1.bf16.msra.mxu1 %v973_v47 }
  0x64   :  { %573 = vmatpush1.bf16.msra.mxu0 %v974_v48  ;;  %533 = vmatprep.subr.bf16.mxu1 %v975_v49 }
  0x65   :  { %574 = vmatprep.subr.bf16.mxu0 %v977_v50 }
  0x67   :  { %534 = vmatpush1.bf16.msra.mxu1 %v979_v51 }
  0x68   :  { %575 = vmatpush1.bf16.msra.mxu0 %v980_v52  ;;  %535 = vmatprep.subr.bf16.mxu1 %v981_v54 }
  0x69   :  { %576 = vmatprep.subr.bf16.mxu0 %v983_v55 }
  0x6b   :  { %536 = vmatpush1.bf16.msra.mxu1 %v985_v60  ;;  %v855_v60 = vld [vmem:[%s1233_s4] ss:$0 sm:$0xff] }
  0x6c   :  { %577 = vmatpush1.bf16.msra.mxu0 %v986_v0  ;;  %537 = vmatprep.subr.bf16.mxu1 %v987_v2 }
  0x6d   :  { %578 = vmatprep.subr.bf16.mxu0 %v989_v4 }
  0x6f   :  { %538 = vmatpush1.bf16.msra.mxu1 %v991_v6 }
  0x70   :  { %579 = vmatpush1.bf16.msra.mxu0 %v992_v8  ;;  %539 = vmatprep.subr.bf16.mxu1 %v993_v10 }
  0x71   :  { %580 = vmatprep.subr.bf16.mxu0 %v995_v11 }
  0x73   :  { %540 = vmatpush1.bf16.msra.mxu1 %v997_v12 }
  0x74   :  { %581 = vmatpush1.bf16.msra.mxu0 %v998_v13  ;;  %541 = vmatprep.subr.bf16.mxu1 %v999_v14 }
  0x75   :  { %582 = vmatprep.subr.bf16.mxu0 %v1001_v15 }
  0x77   :  { %542 = vmatpush1.bf16.msra.mxu1 %v1003_v18 }
  0x78   :  { %583 = vmatpush1.bf16.msra.mxu0 %v1004_v19  ;;  %872 = vmatprep.subr.bf16.mxu1 %v1011_v20 }
  0x7a   :  { %544 = vmatmul.mubr.bf16.vlgmr.msra.gmra.mrb[0].mxu1 %v111_v21 }
  0x7b   :  { %585 = vmatmul.mubr.bf16.vlgmr.msra.gmra.mrb[0].mxu0 %v113_v22  ;;  %873 = vmatpush3.bf16.msra.mxu1 %v1012_v23 }
  0x7c   :  { %874 = vmatprep.subr.bf16.mxu1 %v1013_v24 }
  0x7f   :  { %875 = vmatpush3.bf16.msra.mxu1 %v1014_v25 }
  0x80   :  { %876 = vmatprep.subr.bf16.mxu1 %v1015_v26 }
  0x83   :  { %877 = vmatpush3.bf16.msra.mxu1 %v1016_v27 }
  0x84   :  { %878 = vmatprep.subr.bf16.mxu1 %v1017_v28 }
  0x87   :  { %879 = vmatpush3.bf16.msra.mxu1 %v1018_v29 }
  0x88   :  { %880 = vmatprep.subr.bf16.mxu1 %v1019_v30 }
  0x8b   :  { %881 = vmatpush3.bf16.msra.mxu1 %v1020_v31 }
  0x8c   :  { %882 = vmatprep.subr.bf16.mxu1 %v1021_v32 }
  0x8f   :  { %883 = vmatpush3.bf16.msra.mxu1 %v1022_v33 }
  0x90   :  { %884 = vmatprep.subr.bf16.mxu1 %v1023_v34 }
  0x93   :  { %885 = vmatpush3.bf16.msra.mxu1 %v1024_v35 }
  0x94   :  { %886 = vmatprep.subr.bf16.mxu1 %v1025_v36 }
  0x97   :  { %887 = vmatpush3.bf16.msra.mxu1 %v1026_v37 }
 0x14d   :  { %v545_v43 = vpop.f32.mrb[0].mxu1 }
 0x14e   :  { %v586_v44 = vpop.f32.mrb[0].mxu0  ;;  %v546_v45 = vadd.f32 %v545_v43, %v184_v41  ;;  %v547_v47 = vpop.f32.mrb[1].mxu1 }
 0x14f   :  { %v588_v48 = vpop.f32.mrb[1].mxu0  ;;  %v548_v49 = vadd.f32 %v547_v47, %v188_v42  ;;  %v549_v50 = vpop.f32.mrb[2].mxu1 }
 0x150   :  { %v590_v51 = vpop.f32.mrb[2].mxu0  ;;  %v587_v52 = vadd.f32 %v586_v44, %v546_v45  ;;  %v550_v53 = vpop.f32.mrb[3].mxu1 }
 0x151   :  { %v591_v54 = vpop.f32.mrb[3].mxu0  ;;  %v589_v55 = vadd.f32 %v588_v48, %v548_v49 }
 0x152   :  { %v593_v56 = vmax.f32 %v587_v52, 0.0 }
 0x153   :  { %v594_v57 = vmax.f32 %v589_v55, 0.0 }
 0x154   :  { %v595_v59 = vpack.c.bf16 %v593_v56, %v593_v56 }
 0x155   :  { %v596_v58 = vpack.c.bf16 %v594_v57, %v594_v57 }
 0x157   :  { %764 = vmatprep.mubr.bf16.mxu1 %v596_v58 }
 0x158   :  { %765 = vmatmul.mubr.bf16.vlgmr.msra.gmra.mrb[4].mxu1 %v595_v59 }
 0x22b   :  { %v888_v46 = vpop.f32.mrb[4].mxu1 }
 0x22c   :  { %v889_v61 = vpop.f32.mrb[5].mxu1 }
 0x22d   :  { %v890_v62 = vadd.f32 %v889_v61, %v888_v46  ;;  %v891_v63 = vpop.f32.mrb[6].mxu1 }
 0x22e   :  { %v892_v0 = vpop.f32.mrb[7].mxu1 }
 0x22f   :  { %v767_v1 = vadd.f32 %v890_v62, %v855_v60 }
 0x231   :  { %772 = vst [vmem:[#allocation8] sm:$0xff] %v767_v1 }
 0x232   :  { %777 = vsyncadd [#allocation4], 96  ;;  %s1129_s9 = smov [#allocation8]  }
 0x233   :  { %s778_s10 = sshll.u32 %s1129_s9, 4  ;;  %s779_s10 = int_to_ptr.vmem [resolvable:$true] %s778_s10 }
 0x234   :  { %s1093_s11 = scalar_lea.vmem %s779_s10, 32  ;;  %s1097_s12 = scalar_lea.vmem %s779_s10, 128 }
 0x235   :  { %p1094_p10 = scmp.ne.s32.totalorder %s779_s10, %s1093_s11  ;;  %p1098_p11 = scmp.lt.s32.totalorder %s779_s10, %s779_s10 }
 0x236   :  { %p1099_p12 = scmp.lt.s32.totalorder %s1097_s12, %s1093_s11 }
 0x238   :  { %p1100_p13 = por %p1099_p12, %p1098_p11 }
 0x23a   :  { %p1101_p0 = pnand %p1100_p13, %p1094_p10 }
 0x23c   :  { %1104 = shalt.err (!%p1101_p0)
}
 0x23d   :  { %s1105_s14 = scalar_lea.hbm %s1234_s5, 32 }
 0x23e   :  { %p1106_p1 = scmp.ne.s32.totalorder %s1234_s5, %s1105_s14  ;;  %p1109_p2 = scmp.lt.u32.totalorder %s1105_s14, %s1234_s5 }
 0x240   :  { %p1111_p3 = pnand %p1109_p2, %p1106_p1 }
 0x242   :  { %1114 = shalt.err (!%p1111_p3)
}
 0x243   :  { %s1130_s18 = smov 32   ;;  %s1131_s19 = smov 2  }
 0x244   :  { %784 = dma.vmem_to_hbm [thread:$0]  %s779_s10, 32, %s1234_s5, [#allocation4], %s1130_s18, %s1130_s18, %s1131_s19  }
 0x245   :  { %1119 = dma.done.wait [#allocation4], 128  }
 0x246   :  { %1120 = vsyncadd [#allocation4], 4294967168 }
 0x247   :  { %788 = vsyncpa [#allocation3], 1 }
 0x248   :  { %789 = vsyncpa [#allocation6], 1 }
 0x249   :  { %790 = vsyncpa [#allocation4], 1 }

</bundles_post_ra>
